<compile_context>
chip_gen: v7x
topology: tpu7x:2x2x1
jax: 0.10.0
libtpu: 0.0.40
codegen_flags: <defaults>
</compile_context>

<pallas_src>
import functools
import math

import jax
import jax.numpy as jnp
from jax import lax
from jax.experimental import pallas as pl
from jax.experimental.pallas import tpu as pltpu


GELU_C = math.sqrt(2.0 / math.pi)
LN_EPS = 1e-5  # torch nn.LayerNorm default
_NT_DIMS = (((1,), (1,)), ((), ()))  # contract dim 1 of both operands: q @ k^T w/o transpose


def _vmem_limit_bytes(f32_elems, headroom=1.5):
    # v7x has only 64 MiB of physical VMEM per TensorCore -> cap the scoped request at
    # 56 MiB so the same kernel is valid on v5e / v6e / v7x.
    want = int(f32_elems * 4 * headroom)
    return max(16 * 1024 * 1024, min(56 * 1024 * 1024, want))


def _pick_tile(n, candidates):
    for c in candidates:
        if n % c == 0:
            return c
    return n


# ----------------------------------------------------------------------------
# Kernel 1: LayerNorm1 + multi-head attention + output projection + residual
#   grid over batch ("parallel"); packed QKV weight and Wo are VMEM-resident.
# ----------------------------------------------------------------------------
def _attn_block_kernel(x_ref, g1_ref, bt1_ref, wqkv_ref, bqkv_ref, wo_ref, bo_ref,
                       o_ref, *, num_heads, head_dim):
    x = x_ref[0]                                              # (S, H)
    dt = x_ref.dtype
    hidden = x.shape[-1]

    # LayerNorm 1 (biased variance, eps = 1e-5, affine) in f32
    xf = x.astype(jnp.float32)
    mu = jnp.mean(xf, axis=-1, keepdims=True)
    var = jnp.mean(jnp.square(xf - mu), axis=-1, keepdims=True)
    h = ((xf - mu) * lax.rsqrt(var + LN_EPS) * g1_ref[...] + bt1_ref[...]).astype(dt)

    # Fused Q/K/V projection: single MXU launch with N = 3H, f32 accumulation.
    qkv = jnp.dot(h, wqkv_ref[...], preferred_element_type=jnp.float32) + bqkv_ref[...]

    inv_sqrt_d = 1.0 / math.sqrt(head_dim)
    outs = []
    for hd in range(num_heads):                               # static unroll, traced once
        lo = hd * head_dim
        qh = qkv[:, lo:lo + head_dim].astype(dt)
        kh = qkv[:, hidden + lo:hidden + lo + head_dim].astype(dt)
        vh = qkv[:, 2 * hidden + lo:2 * hidden + lo + head_dim].astype(dt)
        # scores = q @ k^T via NT dot_general (no explicit XLU transpose)
        s = lax.dot_general(qh, kh, _NT_DIMS,
                            preferred_element_type=jnp.float32) * inv_sqrt_d
        s = s - jnp.max(s, axis=-1, keepdims=True)
        e = jnp.exp(s)
        inv_l = pl.reciprocal(jnp.sum(e, axis=-1, keepdims=True), approx=True)  # EUP slot
        p = (e * inv_l).astype(dt)                            # softmax; attn dropout = identity
        outs.append(jnp.dot(p, vh, preferred_element_type=jnp.float32))

    # Concatenate heads once, then a single full-H-contraction output projection.
    o_all = jnp.concatenate(outs, axis=-1).astype(dt)         # (S, H)
    proj = jnp.dot(o_all, wo_ref[...], preferred_element_type=jnp.float32) + bo_ref[...]

    # hidden dropout is identity in eval mode; residual add
    o_ref[0] = (xf + proj).astype(o_ref.dtype)


# ----------------------------------------------------------------------------
# Kernel 2: LayerNorm2 + dense_1 + NewGELU + dense_2 + residual
#   grid = (M // TM, I // TI); I (contraction of dense_2) streamed last into an
#   f32 accumulator scratch; dense_2 bias folded into the accumulator init.
# ----------------------------------------------------------------------------
def _ln_mlp_kernel(x_ref, g2_ref, bt2_ref, w1_ref, b1_ref, w2_ref, b2_ref,
                   o_ref, h_sc, acc_sc):
    kk = pl.program_id(1)

    @pl.when(kk == 0)
    def _():
        x = x_ref[...].astype(jnp.float32)
        mu = jnp.mean(x, axis=-1, keepdims=True)
        var = jnp.mean(jnp.square(x - mu), axis=-1, keepdims=True)
        h_sc[...] = ((x - mu) * lax.rsqrt(var + LN_EPS)
                     * g2_ref[...] + bt2_ref[...]).astype(h_sc.dtype)
        # fold dense_2 bias into the accumulator init
        acc_sc[...] = jnp.broadcast_to(b2_ref[...], acc_sc.shape).astype(jnp.float32)

    a = jnp.dot(h_sc[...], w1_ref[...], preferred_element_type=jnp.float32) + b1_ref[...]
    # NewGELU: 0.5*x*(1+tanh(sqrt(2/pi)*(x + 0.044715*x^3)))  -- tanh runs on the EUP slot
    a = 0.5 * a * (1.0 + jnp.tanh(GELU_C * (a + 0.044715 * (a * a * a))))
    # cast back to the weight dtype so dense_2 takes the fast MXU path when params are bf16
    acc_sc[...] += jnp.dot(a.astype(w2_ref.dtype), w2_ref[...],
                           preferred_element_type=jnp.float32)

    @pl.when(kk == pl.num_programs(1) - 1)
    def _():
        # hidden dropout is identity in eval mode; residual add
        o_ref[...] = (x_ref[...].astype(jnp.float32) + acc_sc[...]).astype(o_ref.dtype)


# ----------------------------------------------------------------------------
# Wrapper
# ----------------------------------------------------------------------------
def transformer_block_forward(x, p, num_heads):
    """x: [B, S, H] -> [B, S, H]. Eval-mode TransformerBlock forward."""
    B, S, H = x.shape
    dh = H // num_heads
    inter = p["w1"].shape[1]
    dt = x.dtype

    # Pack Q|K|V weights/biases column-wise for the fused projection.
    wqkv = jnp.concatenate([p["wq"], p["wk"], p["wv"]], axis=1)            # (H, 3H)
    bqkv = jnp.concatenate([p["bq"], p["bk"], p["bv"]], axis=0).reshape(1, 3 * H)

    # ---- stage 1: LN1 + MHA + residual (grid over batch, weights resident) ----
    attn_cost = pl.CostEstimate(
        flops=int(B * (8 * S * H * H + 4 * S * S * H)),
        transcendentals=int(B * num_heads * S * S),
        bytes_accessed=int(dt.itemsize * 2 * B * S * H
                           + p["wo"].dtype.itemsize * (4 * H * H + 8 * H)),
    )
    # VMEM accounting (f32 elems): x/out tiles (double-buffered), qkv activation,
    # per-head S x S scores, concatenated head outputs, resident weights + biases.
    attn_elems = (4 * S * H + 3 * S * H + S * S + S * H + 4 * H * H + 8 * H)
    attn_kernel = functools.partial(_attn_block_kernel, num_heads=num_heads, head_dim=dh)

    def full(shape):
        return pl.BlockSpec(shape, lambda b: (0,) * len(shape))

    y = pl.pallas_call(
        attn_kernel,
        out_shape=jax.ShapeDtypeStruct((B, S, H), dt),
        grid_spec=pltpu.PrefetchScalarGridSpec(
            num_scalar_prefetch=0,
            grid=(B,),
            in_specs=[
                pl.BlockSpec((1, S, H), lambda b: (b, 0, 0)),   # x
                full((1, H)), full((1, H)),                      # ln1 gamma, beta
                full((H, 3 * H)), full((1, 3 * H)),              # packed Wqkv, bqkv
                full((H, H)), full((1, H)),                      # Wo, bo
            ],
            out_specs=pl.BlockSpec((1, S, H), lambda b: (b, 0, 0)),
        ),
        compiler_params=pltpu.CompilerParams(
            dimension_semantics=("parallel",),
            vmem_limit_bytes=_vmem_limit_bytes(attn_elems),
        ),
        cost_estimate=attn_cost,
    )(x,
      p["ln1_g"].reshape(1, H), p["ln1_b"].reshape(1, H),
      wqkv, bqkv, p["wo"], p["bo"].reshape(1, H))

    # ---- stage 2: LN2 + MLP + residual (M-tiled, I streamed last) ----
    M = B * S
    TM = _pick_tile(M, (512, 256, 128, 64, 32, 16, 8))
    TI = _pick_tile(inter, (512, 256, 128))
    # Shrink TI until double-buffered W1/W2 panels fit a v7x-safe VMEM budget.
    w_itemsize = p["w1"].dtype.itemsize
    while TI > 128 and inter % (TI // 2) == 0 and \
            2 * (2 * H * TI + TI) * w_itemsize > 40 * 1024 * 1024:
        TI //= 2
    assert M % TM == 0 and inter % TI == 0  # TODO(synk): pad M / inter instead of asserting

    mlp_cost = pl.CostEstimate(
        flops=int(4 * M * H * inter),
        transcendentals=int(M * inter),
        bytes_accessed=int(dt.itemsize * 2 * M * H
                           + w_itemsize * (2 * H * inter + inter + 3 * H)),
    )
    mlp_elems = 6 * TM * H + TM * TI + 4 * H * TI + 4 * TI + 8 * H

    y2 = y.reshape(M, H)
    out = pl.pallas_call(
        _ln_mlp_kernel,
        out_shape=jax.ShapeDtypeStruct((M, H), dt),
        grid_spec=pltpu.PrefetchScalarGridSpec(
            num_scalar_prefetch=0,
            grid=(M // TM, inter // TI),
            in_specs=[
                pl.BlockSpec((TM, H), lambda i, k: (i, 0)),      # x tile (resident over k)
                pl.BlockSpec((1, H), lambda i, k: (0, 0)),       # ln2 gamma
                pl.BlockSpec((1, H), lambda i, k: (0, 0)),       # ln2 beta
                pl.BlockSpec((H, TI), lambda i, k: (0, k)),      # W1 column panel
                pl.BlockSpec((1, TI), lambda i, k: (0, k)),      # b1 panel
                pl.BlockSpec((TI, H), lambda i, k: (k, 0)),      # W2 row panel
                pl.BlockSpec((1, H), lambda i, k: (0, 0)),       # b2 (folded into acc init)
            ],
            out_specs=pl.BlockSpec((TM, H), lambda i, k: (i, 0)),
            scratch_shapes=[pltpu.VMEM((TM, H), dt),             # LN2(x) tile (native dtype)
                            pltpu.VMEM((TM, H), jnp.float32)],   # f32 accumulator
        ),
        compiler_params=pltpu.CompilerParams(
            dimension_semantics=("parallel", "arbitrary"),
            vmem_limit_bytes=_vmem_limit_bytes(mlp_elems),
        ),
        cost_estimate=mlp_cost,
    )(y2,
      p["ln2_g"].reshape(1, H), p["ln2_b"].reshape(1, H),
      p["w1"], p["b1"].reshape(1, inter),
      p["w2"], p["b2"].reshape(1, H))
    return out.reshape(B, S, H)


# ----------------------------------------------------------------------------
# Parameter init (PyTorch nn.Linear / nn.LayerNorm-style) and pure-JAX reference
# ----------------------------------------------------------------------------
def _init_params(key, hidden, intermediate, dtype=jnp.float32):
    ks = jax.random.split(key, 8)

    def linear(k, fan_in, fan_out):
        kw, kb = jax.random.split(k)
        bound = 1.0 / math.sqrt(fan_in)
        w = jax.random.uniform(kw, (fan_in, fan_out), dtype, -bound, bound)
        b = jax.random.uniform(kb, (fan_out,), dtype, -bound, bound)
        return w, b

    wq, bq = linear(ks[0], hidden, hidden)
    wk, bk = linear(ks[1], hidden, hidden)
    wv, bv = linear(ks[2], hidden, hidden)
    wo, bo = linear(ks[3], hidden, hidden)
    w1, b1 = linear(ks[4], hidden, intermediate)
    w2, b2 = linear(ks[5], intermediate, hidden)
    ln1_g = 1.0 + 0.1 * jax.random.normal(ks[6], (hidden,), dtype)
    ln2_g = 1.0 + 0.1 * jax.random.normal(ks[7], (hidden,), dtype)
    ln1_b = 0.1 * jax.random.normal(jax.random.fold_in(ks[6], 1), (hidden,), dtype)
    ln2_b = 0.1 * jax.random.normal(jax.random.fold_in(ks[7], 1), (hidden,), dtype)
    return dict(ln1_g=ln1_g, ln1_b=ln1_b, ln2_g=ln2_g, ln2_b=ln2_b,
                wq=wq, bq=bq, wk=wk, bk=bk, wv=wv, bv=bv, wo=wo, bo=bo,
                w1=w1, b1=b1, w2=w2, b2=b2)


def _reference_transformer_block(x, p, num_heads):
    hp = jax.lax.Precision.HIGHEST

    def ln(v, g, b):
        mu = v.mean(-1, keepdims=True)
        var = jnp.mean(jnp.square(v - mu), -1, keepdims=True)
        return (v - mu) / jnp.sqrt(var + LN_EPS) * g + b

    B, S, H = x.shape
    dh = H // num_heads

    h = ln(x, p["ln1_g"], p["ln1_b"])
    q = jnp.einsum("bsh,hd->bsd", h, p["wq"], precision=hp) + p["bq"]
    k = jnp.einsum("bsh,hd->bsd", h, p["wk"], precision=hp) + p["bk"]
    v = jnp.einsum("bsh,hd->bsd", h, p["wv"], precision=hp) + p["bv"]
    q = q.reshape(B, S, num_heads, dh).transpose(0, 2, 1, 3)
    k = k.reshape(B, S, num_heads, dh).transpose(0, 2, 1, 3)
    v = v.reshape(B, S, num_heads, dh).transpose(0, 2, 1, 3)
    s = jnp.einsum("bnqd,bnkd->bnqk", q, k, precision=hp) / math.sqrt(dh)
    pr = jax.nn.softmax(s, axis=-1)
    o = jnp.einsum("bnqk,bnkd->bnqd", pr, v, precision=hp)
    o = o.transpose(0, 2, 1, 3).reshape(B, S, H)
    attn = jnp.einsum("bsh,hd->bsd", o, p["wo"], precision=hp) + p["bo"]
    x = x + attn

    h2 = ln(x, p["ln2_g"], p["ln2_b"])
    a = jnp.einsum("bsh,hi->bsi", h2, p["w1"], precision=hp) + p["b1"]
    a = 0.5 * a * (1.0 + jnp.tanh(GELU_C * (a + 0.044715 * a ** 3)))
    y = jnp.einsum("bsi,ih->bsh", a, p["w2"], precision=hp) + p["b2"]
    return x + y


if __name__ == "__main__":
    # config: hidden_size=32, intermediate_size=128, num_attention_heads=4,
    #         qkv_bias=True, dropouts inactive (eval mode)
    B, S, H, INTER, NH = 2, 8, 32, 128, 4

    key = jax.random.PRNGKey(0)
    kx, kp = jax.random.split(key)
    x = jax.random.normal(kx, (B, S, H), jnp.float32)
    params = _init_params(kp, H, INTER)

    out = transformer_block_forward(x, params, NH)
    out = jax.block_until_ready(out)

    ref = _reference_transformer_block(x, params, NH)
    assert out.shape == (B, S, H)
    max_err = float(jnp.max(jnp.abs(out - ref)))
    # Tolerance accounts for the approximate EUP reciprocal in the softmax denominator.
    assert jnp.allclose(out, ref, atol=2e-3, rtol=2e-3), f"mismatch vs reference: {max_err}"

    print("KERNEL_OK")
</pallas_src>

<mosaic_0001>
module attributes {stable_mosaic.version = 11 : i64} {
  func.func @_attn_block_kernel(%arg0: i32, %arg1: memref<1x8x32xf32, #tpu.memory_space<vmem>>, %arg2: memref<1x32xf32, #tpu.memory_space<vmem>>, %arg3: memref<1x32xf32, #tpu.memory_space<vmem>>, %arg4: memref<32x96xf32, #tpu.memory_space<vmem>>, %arg5: memref<1x96xf32, #tpu.memory_space<vmem>>, %arg6: memref<32x32xf32, #tpu.memory_space<vmem>>, %arg7: memref<1x32xf32, #tpu.memory_space<vmem>>, %arg8: memref<1x8x32xf32, #tpu.memory_space<vmem>>) attributes {dimension_semantics = [#tpu.dimension_semantics<parallel>], iteration_bounds = array<i64: 2>, scalar_prefetch = 0 : i64, scratch_operands = 0 : i64, tpu.core_type = #tpu.core_type<tc>, window_params = [{transform_indices = @transform_0, window_bounds = array<i64: 1, 8, 32>}, {pipeline_mode = #tpu.pipeline_mode<synchronous>, transform_indices = @transform_1, window_bounds = array<i64: 1, 32>}, {pipeline_mode = #tpu.pipeline_mode<synchronous>, transform_indices = @transform_2, window_bounds = array<i64: 1, 32>}, {pipeline_mode = #tpu.pipeline_mode<synchronous>, transform_indices = @transform_3, window_bounds = array<i64: 32, 96>}, {pipeline_mode = #tpu.pipeline_mode<synchronous>, transform_indices = @transform_4, window_bounds = array<i64: 1, 96>}, {pipeline_mode = #tpu.pipeline_mode<synchronous>, transform_indices = @transform_5, window_bounds = array<i64: 32, 32>}, {pipeline_mode = #tpu.pipeline_mode<synchronous>, transform_indices = @transform_6, window_bounds = array<i64: 1, 32>}, {transform_indices = @transform_7, window_bounds = array<i64: 1, 8, 32>}]} {
    %c0 = arith.constant 0 : index
    %c0_0 = arith.constant 0 : index
    %c0_1 = arith.constant 0 : index
    %0 = vector.load %arg1[%c0, %c0_0, %c0_1] : memref<1x8x32xf32, #tpu.memory_space<vmem>>, vector<1x8x32xf32>
    %1 = vector.shape_cast %0 : vector<1x8x32xf32> to vector<8x32xf32>
    %cst = arith.constant dense<0.000000e+00> : vector<8xf32>
    %2 = vector.multi_reduction <add>, %1, %cst [1] : vector<8x32xf32> to vector<8xf32>
    %3 = vector.shape_cast %2 : vector<8xf32> to vector<8x1xf32>
    %cst_2 = arith.constant 3.200000e+01 : f32
    %4 = vector.broadcast %cst_2 : f32 to vector<8x1xf32>
    %5 = arith.divf %3, %4 : vector<8x1xf32>
    %6 = vector.broadcast %5 : vector<8x1xf32> to vector<8x32xf32>
    %7 = arith.subf %1, %6 : vector<8x32xf32>
    %8 = arith.mulf %7, %7 : vector<8x32xf32>
    %cst_3 = arith.constant dense<0.000000e+00> : vector<8xf32>
    %9 = vector.multi_reduction <add>, %8, %cst_3 [1] : vector<8x32xf32> to vector<8xf32>
    %10 = vector.shape_cast %9 : vector<8xf32> to vector<8x1xf32>
    %cst_4 = arith.constant 3.200000e+01 : f32
    %11 = vector.broadcast %cst_4 : f32 to vector<8x1xf32>
    %12 = arith.divf %10, %11 : vector<8x1xf32>
    %13 = vector.broadcast %5 : vector<8x1xf32> to vector<8x32xf32>
    %14 = arith.subf %1, %13 : vector<8x32xf32>
    %cst_5 = arith.constant 9.99999974E-6 : f32
    %15 = vector.broadcast %cst_5 : f32 to vector<8x1xf32>
    %16 = arith.addf %12, %15 : vector<8x1xf32>
    %17 = math.rsqrt %16 : vector<8x1xf32>
    %18 = vector.broadcast %17 : vector<8x1xf32> to vector<8x32xf32>
    %19 = arith.mulf %14, %18 : vector<8x32xf32>
    %c0_6 = arith.constant 0 : index
    %c0_7 = arith.constant 0 : index
    %20 = vector.load %arg2[%c0_6, %c0_7] : memref<1x32xf32, #tpu.memory_space<vmem>>, vector<1x32xf32>
    %21 = vector.broadcast %20 : vector<1x32xf32> to vector<8x32xf32>
    %22 = arith.mulf %19, %21 : vector<8x32xf32>
    %c0_8 = arith.constant 0 : index
    %c0_9 = arith.constant 0 : index
    %23 = vector.load %arg3[%c0_8, %c0_9] : memref<1x32xf32, #tpu.memory_space<vmem>>, vector<1x32xf32>
    %24 = vector.broadcast %23 : vector<1x32xf32> to vector<8x32xf32>
    %25 = arith.addf %22, %24 : vector<8x32xf32>
    %c0_10 = arith.constant 0 : index
    %c0_11 = arith.constant 0 : index
    %26 = vector.load %arg4[%c0_10, %c0_11] : memref<32x96xf32, #tpu.memory_space<vmem>>, vector<32x96xf32>
    %cst_12 = arith.constant dense<0.000000e+00> : vector<8x96xf32>
    %27 = tpu.matmul %25, %26, %cst_12 {dimension_numbers = #tpu.dot_dimension_numbers<[1], [0], [0], [1], [0, 0, 1, 1], [], []>} : vector<8x32xf32>, vector<32x96xf32>, vector<8x96xf32> -> vector<8x96xf32>
    %c0_13 = arith.constant 0 : index
    %c0_14 = arith.constant 0 : index
    %28 = vector.load %arg5[%c0_13, %c0_14] : memref<1x96xf32, #tpu.memory_space<vmem>>, vector<1x96xf32>
    %29 = vector.broadcast %28 : vector<1x96xf32> to vector<8x96xf32>
    %30 = arith.addf %27, %29 : vector<8x96xf32>
    %31 = vector.extract_strided_slice %30 {offsets = [0, 0], sizes = [8, 8], strides = [1, 1]} : vector<8x96xf32> to vector<8x8xf32>
    %32 = vector.extract_strided_slice %30 {offsets = [0, 32], sizes = [8, 8], strides = [1, 1]} : vector<8x96xf32> to vector<8x8xf32>
    %33 = vector.extract_strided_slice %30 {offsets = [0, 64], sizes = [8, 8], strides = [1, 1]} : vector<8x96xf32> to vector<8x8xf32>
    %cst_15 = arith.constant dense<0.000000e+00> : vector<8x8xf32>
    %34 = tpu.matmul %31, %32, %cst_15 {dimension_numbers = #tpu.dot_dimension_numbers<[1], [1], [0], [0], [0, 0, 1, 0], [], []>} : vector<8x8xf32>, vector<8x8xf32>, vector<8x8xf32> -> vector<8x8xf32>
    %cst_16 = arith.constant 0.353553385 : f32
    %35 = vector.broadcast %cst_16 : f32 to vector<8x8xf32>
    %36 = arith.mulf %34, %35 : vector<8x8xf32>
    %cst_17 = arith.constant dense<0xFF800000> : vector<8xf32>
    %37 = vector.multi_reduction <maximumf>, %36, %cst_17 [1] : vector<8x8xf32> to vector<8xf32>
    %38 = vector.shape_cast %37 : vector<8xf32> to vector<8x1xf32>
    %39 = vector.broadcast %38 : vector<8x1xf32> to vector<8x8xf32>
    %40 = arith.subf %36, %39 : vector<8x8xf32>
    %41 = math.exp %40 : vector<8x8xf32>
    %cst_18 = arith.constant dense<0.000000e+00> : vector<8xf32>
    %42 = vector.multi_reduction <add>, %41, %cst_18 [1] : vector<8x8xf32> to vector<8xf32>
    %43 = vector.shape_cast %42 : vector<8xf32> to vector<8x1xf32>
    %44 = tpu.reciprocal %43 {approx = true} : vector<8x1xf32> -> vector<8x1xf32>
    %45 = vector.broadcast %44 : vector<8x1xf32> to vector<8x8xf32>
    %46 = arith.mulf %41, %45 : vector<8x8xf32>
    %cst_19 = arith.constant dense<0.000000e+00> : vector<8x8xf32>
    %47 = tpu.matmul %46, %33, %cst_19 {dimension_numbers = #tpu.dot_dimension_numbers<[1], [0], [0], [1], [0, 0, 1, 1], [], []>} : vector<8x8xf32>, vector<8x8xf32>, vector<8x8xf32> -> vector<8x8xf32>
    %48 = vector.extract_strided_slice %30 {offsets = [0, 8], sizes = [8, 8], strides = [1, 1]} : vector<8x96xf32> to vector<8x8xf32>
    %49 = vector.extract_strided_slice %30 {offsets = [0, 40], sizes = [8, 8], strides = [1, 1]} : vector<8x96xf32> to vector<8x8xf32>
    %50 = vector.extract_strided_slice %30 {offsets = [0, 72], sizes = [8, 8], strides = [1, 1]} : vector<8x96xf32> to vector<8x8xf32>
    %cst_20 = arith.constant dense<0.000000e+00> : vector<8x8xf32>
    %51 = tpu.matmul %48, %49, %cst_20 {dimension_numbers = #tpu.dot_dimension_numbers<[1], [1], [0], [0], [0, 0, 1, 0], [], []>} : vector<8x8xf32>, vector<8x8xf32>, vector<8x8xf32> -> vector<8x8xf32>
    %cst_21 = arith.constant 0.353553385 : f32
    %52 = vector.broadcast %cst_21 : f32 to vector<8x8xf32>
    %53 = arith.mulf %51, %52 : vector<8x8xf32>
    %cst_22 = arith.constant dense<0xFF800000> : vector<8xf32>
    %54 = vector.multi_reduction <maximumf>, %53, %cst_22 [1] : vector<8x8xf32> to vector<8xf32>
    %55 = vector.shape_cast %54 : vector<8xf32> to vector<8x1xf32>
    %56 = vector.broadcast %55 : vector<8x1xf32> to vector<8x8xf32>
    %57 = arith.subf %53, %56 : vector<8x8xf32>
    %58 = math.exp %57 : vector<8x8xf32>
    %cst_23 = arith.constant dense<0.000000e+00> : vector<8xf32>
    %59 = vector.multi_reduction <add>, %58, %cst_23 [1] : vector<8x8xf32> to vector<8xf32>
    %60 = vector.shape_cast %59 : vector<8xf32> to vector<8x1xf32>
    %61 = tpu.reciprocal %60 {approx = true} : vector<8x1xf32> -> vector<8x1xf32>
    %62 = vector.broadcast %61 : vector<8x1xf32> to vector<8x8xf32>
    %63 = arith.mulf %58, %62 : vector<8x8xf32>
    %cst_24 = arith.constant dense<0.000000e+00> : vector<8x8xf32>
    %64 = tpu.matmul %63, %50, %cst_24 {dimension_numbers = #tpu.dot_dimension_numbers<[1], [0], [0], [1], [0, 0, 1, 1], [], []>} : vector<8x8xf32>, vector<8x8xf32>, vector<8x8xf32> -> vector<8x8xf32>
    %65 = vector.extract_strided_slice %30 {offsets = [0, 16], sizes = [8, 8], strides = [1, 1]} : vector<8x96xf32> to vector<8x8xf32>
    %66 = vector.extract_strided_slice %30 {offsets = [0, 48], sizes = [8, 8], strides = [1, 1]} : vector<8x96xf32> to vector<8x8xf32>
    %67 = vector.extract_strided_slice %30 {offsets = [0, 80], sizes = [8, 8], strides = [1, 1]} : vector<8x96xf32> to vector<8x8xf32>
    %cst_25 = arith.constant dense<0.000000e+00> : vector<8x8xf32>
    %68 = tpu.matmul %65, %66, %cst_25 {dimension_numbers = #tpu.dot_dimension_numbers<[1], [1], [0], [0], [0, 0, 1, 0], [], []>} : vector<8x8xf32>, vector<8x8xf32>, vector<8x8xf32> -> vector<8x8xf32>
    %cst_26 = arith.constant 0.353553385 : f32
    %69 = vector.broadcast %cst_26 : f32 to vector<8x8xf32>
    %70 = arith.mulf %68, %69 : vector<8x8xf32>
    %cst_27 = arith.constant dense<0xFF800000> : vector<8xf32>
    %71 = vector.multi_reduction <maximumf>, %70, %cst_27 [1] : vector<8x8xf32> to vector<8xf32>
    %72 = vector.shape_cast %71 : vector<8xf32> to vector<8x1xf32>
    %73 = vector.broadcast %72 : vector<8x1xf32> to vector<8x8xf32>
    %74 = arith.subf %70, %73 : vector<8x8xf32>
    %75 = math.exp %74 : vector<8x8xf32>
    %cst_28 = arith.constant dense<0.000000e+00> : vector<8xf32>
    %76 = vector.multi_reduction <add>, %75, %cst_28 [1] : vector<8x8xf32> to vector<8xf32>
    %77 = vector.shape_cast %76 : vector<8xf32> to vector<8x1xf32>
    %78 = tpu.reciprocal %77 {approx = true} : vector<8x1xf32> -> vector<8x1xf32>
    %79 = vector.broadcast %78 : vector<8x1xf32> to vector<8x8xf32>
    %80 = arith.mulf %75, %79 : vector<8x8xf32>
    %cst_29 = arith.constant dense<0.000000e+00> : vector<8x8xf32>
    %81 = tpu.matmul %80, %67, %cst_29 {dimension_numbers = #tpu.dot_dimension_numbers<[1], [0], [0], [1], [0, 0, 1, 1], [], []>} : vector<8x8xf32>, vector<8x8xf32>, vector<8x8xf32> -> vector<8x8xf32>
    %82 = vector.extract_strided_slice %30 {offsets = [0, 24], sizes = [8, 8], strides = [1, 1]} : vector<8x96xf32> to vector<8x8xf32>
    %83 = vector.extract_strided_slice %30 {offsets = [0, 56], sizes = [8, 8], strides = [1, 1]} : vector<8x96xf32> to vector<8x8xf32>
    %84 = vector.extract_strided_slice %30 {offsets = [0, 88], sizes = [8, 8], strides = [1, 1]} : vector<8x96xf32> to vector<8x8xf32>
    %cst_30 = arith.constant dense<0.000000e+00> : vector<8x8xf32>
    %85 = tpu.matmul %82, %83, %cst_30 {dimension_numbers = #tpu.dot_dimension_numbers<[1], [1], [0], [0], [0, 0, 1, 0], [], []>} : vector<8x8xf32>, vector<8x8xf32>, vector<8x8xf32> -> vector<8x8xf32>
    %cst_31 = arith.constant 0.353553385 : f32
    %86 = vector.broadcast %cst_31 : f32 to vector<8x8xf32>
    %87 = arith.mulf %85, %86 : vector<8x8xf32>
    %cst_32 = arith.constant dense<0xFF800000> : vector<8xf32>
    %88 = vector.multi_reduction <maximumf>, %87, %cst_32 [1] : vector<8x8xf32> to vector<8xf32>
    %89 = vector.shape_cast %88 : vector<8xf32> to vector<8x1xf32>
    %90 = vector.broadcast %89 : vector<8x1xf32> to vector<8x8xf32>
    %91 = arith.subf %87, %90 : vector<8x8xf32>
    %92 = math.exp %91 : vector<8x8xf32>
    %cst_33 = arith.constant dense<0.000000e+00> : vector<8xf32>
    %93 = vector.multi_reduction <add>, %92, %cst_33 [1] : vector<8x8xf32> to vector<8xf32>
    %94 = vector.shape_cast %93 : vector<8xf32> to vector<8x1xf32>
    %95 = tpu.reciprocal %94 {approx = true} : vector<8x1xf32> -> vector<8x1xf32>
    %96 = vector.broadcast %95 : vector<8x1xf32> to vector<8x8xf32>
    %97 = arith.mulf %92, %96 : vector<8x8xf32>
    %cst_34 = arith.constant dense<0.000000e+00> : vector<8x8xf32>
    %98 = tpu.matmul %97, %84, %cst_34 {dimension_numbers = #tpu.dot_dimension_numbers<[1], [0], [0], [1], [0, 0, 1, 1], [], []>} : vector<8x8xf32>, vector<8x8xf32>, vector<8x8xf32> -> vector<8x8xf32>
    %99 = tpu.concatenate %47, %64, %81, %98 in 1 : vector<8x8xf32>, vector<8x8xf32>, vector<8x8xf32>, vector<8x8xf32> -> vector<8x32xf32>
    %c0_35 = arith.constant 0 : index
    %c0_36 = arith.constant 0 : index
    %100 = vector.load %arg6[%c0_35, %c0_36] : memref<32x32xf32, #tpu.memory_space<vmem>>, vector<32x32xf32>
    %cst_37 = arith.constant dense<0.000000e+00> : vector<8x32xf32>
    %101 = tpu.matmul %99, %100, %cst_37 {dimension_numbers = #tpu.dot_dimension_numbers<[1], [0], [0], [1], [0, 0, 1, 1], [], []>} : vector<8x32xf32>, vector<32x32xf32>, vector<8x32xf32> -> vector<8x32xf32>
    %c0_38 = arith.constant 0 : index
    %c0_39 = arith.constant 0 : index
    %102 = vector.load %arg7[%c0_38, %c0_39] : memref<1x32xf32, #tpu.memory_space<vmem>>, vector<1x32xf32>
    %103 = vector.broadcast %102 : vector<1x32xf32> to vector<8x32xf32>
    %104 = arith.addf %101, %103 : vector<8x32xf32>
    %105 = arith.addf %1, %104 : vector<8x32xf32>
    %c0_40 = arith.constant 0 : index
    %c0_41 = arith.constant 0 : index
    %c0_42 = arith.constant 0 : index
    %106 = vector.load %arg8[%c0_40, %c0_41, %c0_42] : memref<1x8x32xf32, #tpu.memory_space<vmem>>, vector<1x8x32xf32>
    %107 = vector.shape_cast %106 : vector<1x8x32xf32> to vector<8x32xf32>
    %108 = vector.shape_cast %105 : vector<8x32xf32> to vector<1x8x32xf32>
    tpu.vector_store %arg8[%c0_40, %c0_41, %c0_42], %108 {strides = array<i32>} : memref<1x8x32xf32, #tpu.memory_space<vmem>>, vector<1x8x32xf32>,
    return
  }
  func.func @transform_0(%arg0: i32) -> (i32, i32, i32) {
    %c0_i32 = arith.constant 0 : i32
    %c0_i32_0 = arith.constant 0 : i32
    %c0_i32_1 = arith.constant 0 : i32
    return %arg0, %c0_i32, %c0_i32_0 : i32, i32, i32
  }
  func.func @transform_1(%arg0: i32) -> (i32, i32) {
    %c0_i32 = arith.constant 0 : i32
    %c0_i32_0 = arith.constant 0 : i32
    %c0_i32_1 = arith.constant 0 : i32
    return %c0_i32, %c0_i32_0 : i32, i32
  }
  func.func @transform_2(%arg0: i32) -> (i32, i32) {
    %c0_i32 = arith.constant 0 : i32
    %c0_i32_0 = arith.constant 0 : i32
    %c0_i32_1 = arith.constant 0 : i32
    return %c0_i32, %c0_i32_0 : i32, i32
  }
  func.func @transform_3(%arg0: i32) -> (i32, i32) {
    %c0_i32 = arith.constant 0 : i32
    %c0_i32_0 = arith.constant 0 : i32
    %c0_i32_1 = arith.constant 0 : i32
    return %c0_i32, %c0_i32_0 : i32, i32
  }
  func.func @transform_4(%arg0: i32) -> (i32, i32) {
    %c0_i32 = arith.constant 0 : i32
    %c0_i32_0 = arith.constant 0 : i32
    %c0_i32_1 = arith.constant 0 : i32
    return %c0_i32, %c0_i32_0 : i32, i32
  }
  func.func @transform_5(%arg0: i32) -> (i32, i32) {
    %c0_i32 = arith.constant 0 : i32
    %c0_i32_0 = arith.constant 0 : i32
    %c0_i32_1 = arith.constant 0 : i32
    return %c0_i32, %c0_i32_0 : i32, i32
  }
  func.func @transform_6(%arg0: i32) -> (i32, i32) {
    %c0_i32 = arith.constant 0 : i32
    %c0_i32_0 = arith.constant 0 : i32
    %c0_i32_1 = arith.constant 0 : i32
    return %c0_i32, %c0_i32_0 : i32, i32
  }
  func.func @transform_7(%arg0: i32) -> (i32, i32, i32) {
    %c0_i32 = arith.constant 0 : i32
    %c0_i32_0 = arith.constant 0 : i32
    %c0_i32_1 = arith.constant 0 : i32
    return %arg0, %c0_i32, %c0_i32_0 : i32, i32, i32
  }
}

</mosaic_0001>

<bundles_post_ra>
// kernel: tpu_custom_call.1
= control target key start
LH: loop header
LB: loop body
LE: loop exit
PB: predicated region body
PF: predicated region fallthrough
CT: control target
= control target key end

     0   :  { %12 = vsyncpa [#allocation3], 0  ;;  %s2093_s0 = inlined_call_operand.hbm [shape: f32[2,8,32], index: 0, kind: input, shape index: {}]   ;;  %s2094_s1 = inlined_call_operand.vmem [shape: f32[1,32], index: 1, kind: input, shape index: {}]   ;;  %s2095_s2 = inlined_call_operand.vmem [shape: f32[1,32], index: 2, kind: input, shape index: {}]   ;;  %s2096_s3 = inlined_call_operand.hbm [shape: f32[32,96], index: 3, kind: input, shape index: {}]   ;;  %s2097_s4 = inlined_call_operand.vmem [shape: f32[1,96], index: 4, kind: input, shape index: {}]   ;;  %s2098_s5 = inlined_call_operand.hbm [shape: f32[32,32], index: 5, kind: input, shape index: {}]   ;;  %s2099_s6 = inlined_call_operand.vmem [shape: f32[1,32], index: 6, kind: input, shape index: {}]   ;;  %s2100_s7 = inlined_call_operand.hbm [shape: f32[2,8,32], index: 7, kind: output, shape index: {}]  }
   0x1   :  { %14 = vsyncpa [#allocation3 + $0x1], 0 }
   0x2   :  { %15 = vsyncpa [#allocation6], 0 }
   0x3   :  { %16 = vsyncpa [#allocation4], 0 }
   0x4   :  { %18 = vsyncpa [#allocation4 + $0x1], 0  ;;  %s1768_s24 = smov 0   ;;  %s1770_s25 = smov 0  }
   0x5   :  { %s1772_s26 = smov 0   ;;  %s1774_s27 = smov 0  }
   0x6 LB: > { %s1789_s28 = sadd.s32 4294967295, %s1703_s27   ;;  %s1309_s29 = sadd.s32 4294967294, %s1703_s27   ;;  %s1703_s27 = sphi %s1774_s27, %s2120_s27   ;;  %s1699_s26 = sphi %s1772_s26, %s2119_s26   ;;  %s1695_s25 = sphi %s1770_s25, %s2118_s25   ;;  %s1691_s24 = sphi %s1768_s24, %s2117_s24  }
   0x7   : > { %p44_p0 = scmp.ne.s32.totalorder %s1695_s25, %s1691_s24  ;;  %p2101_p1 = scmp.eq.s32.totalorder %s1789_s28, 0 }
   0x8   : > { %p200_p3 = scmp.eq.s32.totalorder %s1309_s29, 1  ;;  %p1310_p5 = scmp.ge.s32.totalorder %s1703_s27, 1 }
   0x9   : > { %p1798_p4 = por %p2101_p1, %p44_p0  ;;  %p207_p7 = scmp.lt.s32.totalorder %s1703_s27, 3 }
   0xa   : > { %p1803_p6 = por %p200_p3, %p44_p0  ;;  %s1705_s10 = smov [#allocation5]  }
   0xb   : > { %s2104_s30 = scalar_select %p1798_p4, 1, 0 }
   0xc   : > { %s2105_s8 = scalar_select %p1803_p6, 1, 0 }
   0xd   : > { %p1808_p8 = pnand %p1310_p5, %p207_p7  ;;  %s225_s11 = sshll.u32 %s1705_s10, 4  ;;  %s1812_s11 = int_to_ptr.vmem [resolvable:$true] %s225_s11 }
   0xe   : > { %s1706_s13 = smov [#allocation7]   ;;  %s1547_s17 = scalar_lea.hbm %s2096_s3, 512 }
   0xf   : > { %p1455_p9 = pneg %p1808_p8  ;;  %s241_s14 = sshll.u32 %s1706_s13, 4  ;;  %s1823_s14 = int_to_ptr.vmem [resolvable:$true] %s241_s14 }
  0x10   : > { %p1548_p12 = scmp.ne.s32.totalorder %s2096_s3, %s1547_s17  ;;  %p1554_p5 = scmp.lt.u32.totalorder %s1547_s17, %s2096_s3 }
  0x11   : > { %p1819_p11 = pnand %p1455_p9, %p2101_p1 }
  0x13   : > { %p1549_p13 = pneg %p1819_p11 }
  0x15   : > { %p1550_p0 = pnand %p1549_p13, %p1548_p12 }
  0x17   : > { %p1551_p3 = pneg %p1550_p0 }
  0x19   : > { %p1556_p7 = pnand %p1554_p5, %p1551_p3 }
  0x1b   : > { %1559 = shalt.err (!%p1556_p7)
}
  0x1c   : > { %s1560_s22 = scalar_lea.vmem %s1812_s11, 512  ;;  %p1568_p2 = scmp.lt.s32.totalorder %s1812_s11, %s1812_s11 }
  0x1d   : > { %p1561_p9 = scmp.ne.s32.totalorder %s1812_s11, %s1560_s22  ;;  %p1569_p12 = scmp.lt.s32.totalorder %s1560_s22, %s1560_s22 }
  0x1f   : > { %p1563_p10 = pnand %p1561_p9, %p1549_p13  ;;  %p1570_p0 = por %p1569_p12, %p1568_p2 }
  0x21   : > { %p1564_p1 = pneg %p1563_p10 }
  0x23   : > { %p1571_p6 = pnand %p1570_p0, %p1564_p1 }
  0x25   : > { %1574 = shalt.err (!%p1571_p6)
}
  0x26   : > { %s1707_s23 = smov 128   ;;  %s1708_s29 = smov 8  }
  0x27   : > { %1458 = dma.hbm_to_vmem [thread:$0]  (!%p1819_p11), %s2096_s3, 512, %s1812_s11, [#allocation6], %s1707_s23, %s1707_s23, %s1708_s29  }
  0x28   : > { %s1575_s17 = scalar_lea.hbm %s2098_s5, 512 }
  0x29   : > { %p1576_p2 = scmp.ne.s32.totalorder %s2098_s5, %s1575_s17  ;;  %p1582_p10 = scmp.lt.u32.totalorder %s1575_s17, %s2098_s5 }
  0x2b   : > { %p1578_p1 = pnand %p1576_p2, %p1549_p13 }
  0x2d   : > { %p1579_p6 = pneg %p1578_p1 }
  0x2f   : > { %p1584_p3 = pnand %p1582_p10, %p1579_p6 }
  0x31   : > { %1587 = shalt.err (!%p1584_p3)
}
  0x32   : > { %s1588_s11 = scalar_lea.vmem %s1823_s14, 512  ;;  %p1596_p12 = scmp.lt.s32.totalorder %s1823_s14, %s1823_s14 }
  0x33   : > { %p1589_p5 = scmp.ne.s32.totalorder %s1823_s14, %s1588_s11  ;;  %p1597_p0 = scmp.lt.s32.totalorder %s1588_s11, %s1588_s11 }
  0x35   : > { %p1591_p7 = pnand %p1589_p5, %p1549_p13  ;;  %p1598_p2 = por %p1597_p0, %p1596_p12 }
  0x37   : > { %p1592_p9 = pneg %p1591_p7 }
  0x39   : > { %p1599_p1 = pnand %p1598_p2, %p1592_p9 }
  0x3b   : > { %1602 = shalt.err (!%p1599_p1)
}
  0x3c   : > { %1461 = dma.hbm_to_vmem [thread:$0]  (!%p1819_p11), %s2098_s5, 512, %s1823_s14, [#allocation6], %s1707_s23, %s1707_s23, %s1708_s29  }
  0x3d   : > { %s1878_s13 = sadd.s32 1, %s1703_s27   ;;  %s31_s12 = sadd.s32 1, %s1699_s26 }
  0x3e   : > { %s28_s15 = ssub.s32 %s1703_s27, %s1878_s13  ;;  %p38_p13 = scmp.ne.s32.totalorder %s1699_s26, %s1695_s25 }
  0x3f   : > { %p29_p6 = scmp.eq.s32.totalorder %s28_s15, 0  ;;  %p39_p10 = scmp.eq.s32.totalorder %s1703_s27, 0 }
  0x40   : > { %p2108_p3 = scmp.eq.s32.totalorder %s1789_s28, 1  ;;  %p1472_p7 = scmp.lt.s32.totalorder %s1703_s27, 2 }
  0x41   : > { %s1894_s17 = scalar_select %p29_p6, %s1699_s26, %s31_s12  }
  0x42   : > { %p1888_p5 = por %p2108_p3, %p38_p13  ;;  %p40_p9 = por %p39_p10, %p38_p13 }
  0x43   : > { %s258_s18 = sand.u32 1, %s1699_s26   ;;  %s1315_s14 = sshll.u32 %s1703_s27, 7 }
  0x44   : > { %s2109_s16 = scalar_select %p1888_p5, 1, 0 }
  0x45   : > { %s1314_s19 = sshll.u32 %s258_s18, 3  ;;  %s1901_s20 = scalar_lea.hbm %s2093_s0, %s1315_s14 }
  0x46   : > { %s262_s21 = scalar_lea.vmem [#allocation2], %s1314_s19  ;;  %p1905_p11 = pnand %p1472_p7, %p40_p9 }
  0x47   : > { %s269_s11 = sshll.u32 %s262_s21, 4  ;;  %s259_s10 = scalar_lea.sflag [#allocation3], %s258_s18  ;;  %s1903_s11 = int_to_ptr.vmem [resolvable:$true] %s269_s11 }
  0x48   : > { %s1603_s12 = scalar_lea.hbm %s1901_s20, 128  ;;  %p1605_p0 = pneg %p1905_p11 }
  0x49   : > { %p1604_p12 = scmp.ne.s32.totalorder %s1901_s20, %s1603_s12  ;;  %s1608_s14 = scalar_lea.hbm %s2093_s0, 256 }
  0x4a   : > { %p1609_p13 = scmp.lt.u32.totalorder %s1901_s20, %s2093_s0  ;;  %p1610_p6 = scmp.lt.u32.totalorder %s1608_s14, %s1603_s12 }
  0x4b   : > { %p1606_p2 = pnand %p1605_p0, %p1604_p12  ;;  %p1612_p3 = scmp.lt.u32.totalorder %s1603_s12, %s1901_s20 }
  0x4c   : > { %p1611_p10 = por %p1610_p6, %p1609_p13 }
  0x4d   : > { %p1607_p1 = pneg %p1606_p2 }
  0x4e   : > { %p1613_p7 = por %p1612_p3, %p1611_p10 }
  0x50   : > { %p1614_p9 = pnand %p1613_p7, %p1607_p1 }
  0x52   : > { %1617 = shalt.err (!%p1614_p9)
}
  0x53   : > { %s1618_s18 = scalar_lea.vmem %s1903_s11, 128  ;;  %s1709_s21 = smov [#allocation2]  }
  0x54   : > { %p1619_p12 = scmp.ne.s32.totalorder %s1903_s11, %s1618_s18  ;;  %s1623_s15 = sshll.u32 %s1709_s21, 4  ;;  %s1624_s15 = int_to_ptr.vmem [resolvable:$false] %s1623_s15 }
  0x55   : > { %s1625_s19 = scalar_lea.vmem %s1624_s15, 256  ;;  %p1626_p4 = scmp.lt.s32.totalorder %s1903_s11, %s1624_s15 }
  0x56   : > { %p1621_p2 = pnand %p1619_p12, %p1605_p0  ;;  %p1627_p13 = scmp.lt.s32.totalorder %s1625_s19, %s1618_s18 }
  0x58   : > { %p1622_p5 = pneg %p1621_p2  ;;  %p1628_p6 = por %p1627_p13, %p1626_p4 }
  0x5a   : > { %p1629_p10 = pnand %p1628_p6, %p1622_p5 }
  0x5c   : > { %1632 = shalt.err (!%p1629_p10)
}
  0x5d   : > { %1465 = dma.hbm_to_vmem [thread:$0]  (!%p1905_p11), %s1901_s20, 128, %s1903_s11, %s259_s10  }
  0x5e   : > { %278 = sbr.rel (%p1808_p8) target bundleno = 2377 (0x949), region = 48  ;;  %s1937_s12 = sand.u32 (!%p1808_p8), 1, %s1695_s25  }
  0x5f   : > { %s1317_s14 = sshll.u32 (!%p1808_p8), %s1937_s12, 3  ;;  %s281_s23 = scalar_lea.sflag (!%p1808_p8), [#allocation3], %s1937_s12 }
  0x60   : > { %s284_s29 = scalar_lea.vmem (!%p1808_p8), [#allocation2], %s1317_s14  ;;  %p2111_p4 = scmp.ne.s32.totalorder (!%p1808_p8), %s2104_s30, 0 }
  0x65   : > { %1678 = dma.done.wait (%p2111_p4), %s281_s23, 128  }
  0x66   : > { %1680 = vsyncadd (%p2111_p4), %s281_s23, 4294967168  ;;  %p2112_p5 = scmp.eq.s32.totalorder %s1789_s28, 0 }
  0x68   : > { %1682 = dma.done.wait (%p2112_p5), [#allocation6], 1024   ;;  %p2113_p8 = pmov %p2112_p5 }
  0x69   : > { %vm324_vm0 = vcmask 261120   ;;  %v1951_v0 = vld [vmem:[%s284_s29] sm:$0xff]  ;;  %v355_v7 = vld [vmem:[#allocation5] sm:$0xff]  ;;  %v356_v8 = vld [vmem:[#allocation5 + $0x8] sm:$0xff]  ;;  %v1710_v10 = vmov 0.0|0.0   ;;  %vm1711_vm1 = vmmov 0  }
  0x6a   : > { %1684 = vsyncadd (%p2113_p8), [#allocation6], 4294966272  ;;  %v325_v1 = vsel %vm324_vm0, %v1951_v0, 0.0  ;;  %v357_v9 = vld [vmem:[#allocation5 + $0x10] sm:$0xff]  ;;  %1431 = vmatprep.subr.bf16.mxu0 %v1710_v10  ;;  %v1432_v11 = vpack.c.bf16 %v356_v8, %v355_v7  ;;  %v358_v12 = vld [vmem:[#allocation5 + $0x18] sm:$0xff]  ;;  %v1712_v13 = vmov 0.0  }
  0x6b   : > { %326 = vadd.xlane.f32.xlu0 %v325_v1  ;;  %1377 = vmatprep.mubr.msk.f32.mxu0 %vm1711_vm1, %v1712_v13  ;;  %v1435_v14 = vpack.c.bf16 %v358_v12, %v357_v9  ;;  %v1321_v19 = vld [vmem:[%s2094_s1] ss:$0 sm:$0xff]  ;;  %s1713_s18 = smov 64   ;;  %s1714_s21 = smov 96   ;;  %vm442_vm2 = vcmask 64512   ;;  %vm1116_vm3 = vcmask 130048  }
  0x6c   : > { %1380 = vmatprep.subr.mxu1 %v1712_v13  ;;  %1382 = vmatprep.mubr.msk.f32.mxu1 %vm1711_vm1, %v1712_v13  ;;  %v1322_v21 = vld [vmem:[%s2095_s2] ss:$0 sm:$0xff]  ;;  %s1715_s15 = smov 88   ;;  %s1716_s19 = smov 120   ;;  %vm1118_vm4 = vcmask 195584  }
  0x6d   : > { %1433 = vmatpush3.bf16.msra.mxu0 %v1432_v11  ;;  %v1323_v24 = vld [vmem:[%s2097_s4] ss:$0 sm:$0xff]  ;;  %s1717_s23 = smov 80   ;;  %s1718_s29 = smov 112  }
  0x6e   : > { %1434 = vmatprep.subr.bf16.mxu0 %v1710_v10  ;;  %s1719_s30 = smov 72   ;;  %s1720_s9 = smov 104  }
  0x6f   : > { %s1721_s20 = smov 48   ;;  %s1722_s11 = smov 56  }
  0x70   : > { %s1723_s22 = smov 40   ;;  %s1724_s10 = smov 8  }
  0x71   : > { %1436 = vmatpush3.bf16.msra.mxu0 %v1435_v14  ;;  %p2114_p0 = scmp.ne.s32.totalorder %s2109_s16, 0 }
  0x72   : > { %1400 = vmatprep.subr.mxu0 %v1712_v13 }
  0xf8   : > { %v327_v2 = vpop.xlane.xlu0 %326 }
  0xf9   : > { %v329_v3 = vmul.f32 0.03125, %v327_v2 }
  0xfb   : > { %v330_v4 = vsub.f32 %v1951_v0, %v329_v3 }
  0xfd   : > { %v331_v5 = vmul.f32 %v330_v4, %v330_v4 }
  0xff   : > { %v332_v6 = vsel %vm324_vm0, %v331_v5, 0.0 }
 0x100   : > { %333 = vadd.xlane.f32.xlu0 %v332_v6 }
 0x18d   : > { %v334_v15 = vpop.xlane.xlu0 %333 }
 0x18e   : > { %v335_v16 = vmul.f32 0.03125, %v334_v15 }
 0x190   : > { %v336_v17 = vadd.f32 1e-05, %v335_v16 }
 0x192   : > { %1529 = vrsqrt.f32 %v336_v17 }
 0x19c   : > { %v1530_v18 = vpop.eup %1529 }
 0x19d   : > { %v338_v20 = vmul.f32 %v1530_v18, %v330_v4 }
 0x19f   : > { %v346_v22 = vmul.f32 %v1321_v19, %v338_v20 }
 0x1a1   : > { %v354_v23 = vadd.f32 %v1322_v21, %v346_v22 }
 0x1a3   : > { %1378 = vmatmul.mubr.msk.f32.vlgmr.msra.gmra.mrb[0].mxu0 %vm324_vm0, %v354_v23 }
 0x1a4   : > { %1402 = vmatprep.mubr.msk.f32.mxu0 %vm1711_vm1, %v1712_v13 }
 0x276   : > { %v435_v25 = vpop.f32.mrb[0].mxu0 }
 0x277   : > { %v1977_v26 = vadd.f32 %v1323_v24, %v435_v25  ;;  %v1379_v27 = vpop.f32.mrb[1].mxu0 }
 0x279   : > { %529 = vrot.lane.b32.xlu0 %v1977_v26, %s1713_s18  ;;  %440 = vrot.lane.b32.xlu1 %v1977_v26, %s1714_s21  ;;  %s1725_s18 = smov 16   ;;  %s1726_s21 = smov 24  }
 0x27d   : > { %607 = vrot.lane.b32.xlu0 %v1977_v26, %s1715_s15 }
 0x281   : > { %605 = vrot.lane.b32.xlu0 %v1977_v26, %s1716_s19 }
 0x2eb   : > { %v441_v28 = vpop.permute.xlu1 %440  ;;  %v530_v29 = vpop.permute.xlu0 %529 }
 0x2ec   : > { %1381 = vmatpush3.xpose.msk.msra.mxu1 %vm442_vm2, %v441_v28  ;;  %v1120_v28 = vld [vmem:[#allocation7] sm:$0xff] }
 0x2ed   : > { %1385 = vmatprep.subr.mxu1 %v1712_v13 }
 0x2ef   : > { %1383 = vmatmul.mubr.msk.f32.vlgmr.msra.gmra.mrb[0].mxu1 %vm442_vm2, %v1977_v26  ;;  %v608_v40 = vpop.permute.xlu0 %607 }
 0x2f0   : > { %1386 = vmatpush3.msra.mxu1 %v530_v29  ;;  %1387 = vmatprep.mubr.msk.f32.mxu1 %vm1711_vm1, %v1712_v13  ;;  %v1121_v29 = vld [vmem:[#allocation7 + $0x8] sm:$0xff] }
 0x2f1   : > { %1390 = vmatprep.subr.mxu1 %v1712_v13 }
 0x2f3   : > { %v606_v41 = vpop.permute.xlu0 %605 }
 0x3c2   : > { %v513_v30 = vpop.f32.mrb[0].mxu1 }
 0x3c3   : > { %v517_v31 = vmul.f32 0.35355338, %v513_v30  ;;  %v1384_v32 = vpop.f32.mrb[1].mxu1  ;;  %v1438_v30 = vpack.c.bf16 %v1121_v29, %v1120_v28 }
 0x3c4   : > { %v1123_v32 = vld [vmem:[#allocation7 + $0x18] sm:$0xff] }
 0x3c5   : > { %v518_v33 = vsel %vm442_vm2, %v517_v31, -inf }
 0x3c6   : > { %519 = vmax.xlane.f32.xlu1 %v518_v33 }
 0x3d7   : > { %773 = vrot.lane.b32.xlu1 %v1977_v26, %s1717_s23  ;;  %s1340_s23 = sshll.u32 %s1789_s28, 7  ;;  %s1207_s28 = scalar_lea.sflag [#allocation4], %s1937_s12 }
 0x453   : > { %v520_v34 = vpop.xlane.xlu1 %519 }
 0x454   : > { %v521_v35 = vsub.f32 %v517_v31, %v520_v34  ;;  %v1122_v31 = vld [vmem:[#allocation7 + $0x10] sm:$0xff] }
 0x455   : > { %v1441_v33 = vpack.c.bf16 %v1123_v32, %v1122_v31 }
 0x456   : > { %v522_v36 = vmul.f32 1.442695, %v521_v35 }
 0x457   : > { %v774_v37 = vpop.permute.xlu1 %773 }
 0x458   : > { %1531 = vpow2.f32 %v522_v36  ;;  %1401 = vmatpush3.xpose.msk.msra.mxu0 %vm442_vm2, %v774_v37 }
 0x459   : > { %1410 = vmatprep.subr.mxu0 %v1712_v13 }
 0x462   : > { %v1532_v38 = vpop.eup %1531 }
 0x463   : > { %v524_v39 = vsel %vm442_vm2, %v1532_v38, 0.0 }
 0x464   : > { %525 = vadd.xlane.f32.xlu0 %v524_v39 }
 0x47a   : > { %771 = vrot.lane.b32.xlu0 %v1977_v26, %s1718_s29  ;;  %s322_s29 = scalar_lea.vmem [#allocation8], %s1317_s14  ;;  %s1727_s14 = smov [#allocation8]  }
 0x47e   : > { %939 = vrot.lane.b32.xlu0 %v1977_v26, %s1719_s30  ;;  %s1220_s30 = sshll.u32 %s322_s29, 4  ;;  %s2050_s30 = int_to_ptr.vmem [resolvable:$true] %s1220_s30 }
 0x482   : > { %937 = vrot.lane.b32.xlu0 %v1977_v26, %s1720_s9 }
 0x4f1   : > { %v526_v42 = vpop.xlane.xlu0 %525 }
 0x4f2   : > { %1533 = vrcp.f32 %v526_v42 }
 0x4f5   : > { %v772_v43 = vpop.permute.xlu0 %771 }
 0x4f6   : > { %1403 = vmatmul.mubr.msk.f32.vlgmr.msra.gmra.mrb[2].mxu0 %vm442_vm2, %v772_v43 }
 0x4f7   : > { %1412 = vmatprep.mubr.msk.f32.mxu0 %vm1711_vm1, %v1712_v13 }
 0x4f9   : > { %v940_v44 = vpop.permute.xlu0 %939 }
 0x4fa   : > { %1411 = vmatpush3.xpose.msk.msra.mxu0 %vm442_vm2, %v940_v44  ;;  %v1337_v44 = vld [vmem:[%s2099_s6] ss:$0 sm:$0xff] }
 0x4fb   : > { %1437 = vmatprep.subr.bf16.mxu0 %v1710_v10 }
 0x4fc   : > { %v1534_v45 = vpop.eup %1533 }
 0x4fd   : > { %v528_v46 = vmul.f32 %v1534_v45, %v1532_v38  ;;  %v938_v47 = vpop.permute.xlu0 %937 }
 0x4fe   : > { %1413 = vmatmul.mubr.msk.f32.vlgmr.msra.gmra.mrb[4].mxu0 %vm442_vm2, %v938_v47 }
 0x4ff   : > { %1388 = vmatmul.mubr.msk.f32.vlgmr.msra.gmra.mrb[2].mxu1 %vm442_vm2, %v528_v46  ;;  %1428 = vmatprep.mubr.msk.f32.mxu0 %vm1711_vm1, %v1712_v13 }
 0x500   : > { %1391 = vmatpush3.xpose.msk.msra.mxu1 %vm442_vm2, %v608_v40  ;;  %1392 = vmatprep.mubr.msk.f32.mxu1 %vm1711_vm1, %v1712_v13 }
 0x501   : > { %1395 = vmatprep.subr.mxu1 %v1712_v13  ;;  %1439 = vmatpush3.bf16.msra.mxu0 %v1438_v30 }
 0x502   : > { %1440 = vmatprep.subr.bf16.mxu0 %v1710_v10 }
 0x503   : > { %1393 = vmatmul.mubr.msk.f32.vlgmr.msra.gmra.mrb[4].mxu1 %vm442_vm2, %v606_v41 }
 0x504   : > { %1397 = vmatprep.mubr.msk.f32.mxu1 %vm1711_vm1, %v1712_v13 }
 0x505   : > { %1442 = vmatpush3.bf16.msra.mxu0 %v1441_v33 }
 0x5c9   : > { %v845_v48 = vpop.f32.mrb[2].mxu0 }
 0x5ca   : > { %v849_v49 = vmul.f32 0.35355338, %v845_v48  ;;  %v1404_v50 = vpop.f32.mrb[3].mxu0 }
 0x5cc   : > { %v850_v51 = vsel %vm442_vm2, %v849_v49, -inf }
 0x5cd   : > { %851 = vmax.xlane.f32.xlu1 %v850_v51 }
 0x5d1   : > { %v1011_v52 = vpop.f32.mrb[4].mxu0 }
 0x5d2   : > { %v2015_v53 = vpop.f32.mrb[2].mxu1  ;;  %v1414_v54 = vpop.f32.mrb[5].mxu0  ;;  %v1015_v59 = vmul.f32 0.35355338, %v1011_v52 }
 0x5d3   : > { %v1389_v55 = vpop.f32.mrb[3].mxu1 }
 0x5d4   : > { %v1016_v61 = vsel %vm442_vm2, %v1015_v59, -inf }
 0x5d6   : > { %v679_v56 = vpop.f32.mrb[4].mxu1 }
 0x5d7   : > { %v683_v57 = vmul.f32 0.35355338, %v679_v56  ;;  %v1394_v58 = vpop.f32.mrb[5].mxu1 }
 0x5d9   : > { %v684_v60 = vsel %vm442_vm2, %v683_v57, -inf }
 0x5da   : > { %685 = vmax.xlane.f32.xlu0 %v684_v60 }
 0x5de   : > { %1017 = vmax.xlane.f32.xlu0 %v1016_v61 }
 0x65a   : > { %v852_v62 = vpop.xlane.xlu1 %851 }
 0x65b   : > { %v853_v63 = vsub.f32 %v849_v49, %v852_v62 }
 0x65d   : > { %v854_v1 = vmul.f32 1.442695, %v853_v63 }
 0x65f   : > { %1535 = vpow2.f32 %v854_v1 }
 0x667   : > { %v686_v2 = vpop.xlane.xlu0 %685 }
 0x668   : > { %v687_v3 = vsub.f32 %v683_v57, %v686_v2 }
 0x669   : > { %v1536_v4 = vpop.eup %1535 }
 0x66a   : > { %v688_v5 = vmul.f32 1.442695, %v687_v3  ;;  %v856_v6 = vsel %vm442_vm2, %v1536_v4, 0.0 }
 0x66b   : > { %857 = vadd.xlane.f32.xlu0 %v856_v6  ;;  %v1018_v7 = vpop.xlane.xlu0 %1017 }
 0x66c   : > { %1537 = vpow2.f32 %v688_v5  ;;  %v1019_v8 = vsub.f32 %v1015_v59, %v1018_v7 }
 0x66e   : > { %v1020_v9 = vmul.f32 1.442695, %v1019_v8 }
 0x670   : > { %1539 = vpow2.f32 %v1020_v9 }
 0x676   : > { %v1538_v11 = vpop.eup %1537 }
 0x677   : > { %v690_v12 = vsel %vm442_vm2, %v1538_v11, 0.0 }
 0x678   : > { %691 = vadd.xlane.f32.xlu0 %v690_v12 }
 0x67a   : > { %v1540_v14 = vpop.eup %1539 }
 0x67b   : > { %v1022_v15 = vsel %vm442_vm2, %v1540_v14, 0.0 }
 0x67c   : > { %1023 = vadd.xlane.f32.xlu1 %v1022_v15 }
 0x68d   : > { %861 = vrot.lane.b32.xlu1 %v1977_v26, %s1721_s20 }
 0x68e   : > { %695 = vrot.lane.b32.xlu0 %v1977_v26, %s1722_s11  ;;  %s2048_s11 = scalar_lea.hbm %s2100_s7, %s1340_s23 }
 0x691   : > { %1027 = vrot.lane.b32.xlu1 %v1977_v26, %s1723_s22  ;;  %s1633_s22 = scalar_lea.vmem %s2050_s30, 128 }
 0x692   : > { %p1634_p11 = scmp.ne.s32.totalorder %s2050_s30, %s1633_s22 }
 0x694   : > { %p1635_p1 = pnand %p1634_p11, %p2114_p0 }
 0x696   : > { %p1636_p3 = pneg %p1635_p1 }
 0x6f8   : > { %v858_v16 = vpop.xlane.xlu0 %857 }
 0x705   : > { %v692_v17 = vpop.xlane.xlu0 %691 }
 0x706   : > { %1541 = vrcp.f32 %v692_v17 }
 0x707   : > { %1543 = vrcp.f32 %v858_v16 }
 0x709   : > { %v1024_v18 = vpop.xlane.xlu1 %1023  ;;  %v696_v19 = vpop.permute.xlu0 %695 }
 0x70a   : > { %1396 = vmatpush3.msra.mxu1 %v696_v19  ;;  %1545 = vrcp.f32 %v1024_v18 }
 0x70b   : > { %1405 = vmatprep.subr.mxu1 %v1712_v13 }
 0x70d   : > { %v862_v22 = vpop.permute.xlu1 %861 }
 0x710   : > { %v1542_v20 = vpop.eup %1541 }
 0x711   : > { %v694_v21 = vmul.f32 %v1542_v20, %v1538_v11  ;;  %v1544_v23 = vpop.eup %1543  ;;  %v1028_v26 = vpop.permute.xlu1 %1027 }
 0x712   : > { %v860_v24 = vmul.f32 %v1544_v23, %v1536_v4 }
 0x713   : > { %1398 = vmatmul.mubr.msk.f32.vlgmr.msra.gmra.mrb[6].mxu1 %vm442_vm2, %v694_v21 }
 0x714   : > { %1406 = vmatpush3.msra.mxu1 %v862_v22  ;;  %1407 = vmatprep.mubr.msk.f32.mxu1 %vm1711_vm1, %v1712_v13  ;;  %v1546_v25 = vpop.eup %1545 }
 0x715   : > { %1415 = vmatprep.subr.mxu1 %v1712_v13  ;;  %v1026_v27 = vmul.f32 %v1546_v25, %v1540_v14 }
 0x717   : > { %1408 = vmatmul.mubr.msk.f32.vlgmr.msra.gmra.mrb[8].mxu1 %vm442_vm2, %v860_v24 }
 0x718   : > { %1416 = vmatpush3.msra.mxu1 %v1028_v26  ;;  %1417 = vmatprep.mubr.msk.f32.mxu1 %vm1711_vm1, %v1712_v13 }
 0x71b   : > { %1418 = vmatmul.mubr.msk.f32.vlgmr.msra.gmra.mrb[10].mxu1 %vm442_vm2, %v1026_v27 }
 0x7e6   : > { %v767_v34 = vpop.f32.mrb[6].mxu1 }
 0x7e7   : > { %1104 = vrot.lane.b32.xlu1 %v767_v34, %s1724_s10  ;;  %v1399_v35 = vpop.f32.mrb[7].mxu1  ;;  %s1637_s10 = sshll.u32 %s1727_s14, 4  ;;  %s1638_s10 = int_to_ptr.vmem [resolvable:$false] %s1637_s10 }
 0x7e8   : > { %p1640_p7 = scmp.lt.s32.totalorder %s2050_s30, %s1638_s10 }
 0x7ea   : > { %v933_v36 = vpop.f32.mrb[8].mxu1 }
 0x7eb   : > { %1108 = vrot.lane.b32.xlu0 %v933_v36, %s1725_s18  ;;  %v1409_v13 = vpop.f32.mrb[9].mxu1  ;;  %s1639_s18 = scalar_lea.vmem %s1638_s10, 256 }
 0x7ec   : > { %p1641_p9 = scmp.lt.s32.totalorder %s1639_s18, %s1633_s22 }
 0x7ee   : > { %v1099_v37 = vpop.f32.mrb[10].mxu1  ;;  %p1642_p12 = por %p1641_p9, %p1640_p7 }
 0x7ef   : > { %1112 = vrot.lane.b32.xlu1 %v1099_v37, %s1726_s21  ;;  %v1419_v38 = vpop.f32.mrb[11].mxu1 }
 0x7f0   : > { %p1643_p2 = pnand %p1642_p12, %p1636_p3 }
 0x859   : > { %v1105_v39 = vpop.permute.xlu1 %1104 }
 0x85a   : > { %v1115_v40 = vsel %vm442_vm2, %v2015_v53, %v1105_v39 }
 0x85d   : > { %v1109_v10 = vpop.permute.xlu0 %1108 }
 0x85e   : > { %v1117_v41 = vsel %vm1116_vm3, %v1115_v40, %v1109_v10 }
 0x861   : > { %v1113_v42 = vpop.permute.xlu1 %1112 }
 0x862   : > { %v1119_v43 = vsel %vm1118_vm4, %v1117_v41, %v1113_v42 }
 0x863   : > { %1429 = vmatmul.mubr.msk.f32.vlgmr.msra.gmra.mrb[6].mxu0 %vm324_vm0, %v1119_v43 }
 0x936   : > { %v1200_v45 = vpop.f32.mrb[6].mxu0 }
 0x937   : > { %v1201_v46 = vadd.f32 %v1337_v44, %v1200_v45  ;;  %v1430_v47 = vpop.f32.mrb[7].mxu0 }
 0x939   : > { %v1204_v48 = vadd.f32 %v1201_v46, %v1951_v0 }
 0x93b   : > { %1205 = vst.msk [vmem:[%s322_s29] sm:$0xff] %vm324_vm0, %v1204_v48 }
 0x93c   : > { %1646 = shalt.err (!%p1643_p2)
}
 0x93d   : > { %s1647_s12 = scalar_lea.hbm %s2048_s11, 128  ;;  %s1651_s19 = scalar_lea.hbm %s2100_s7, 256 }
 0x93e   : > { %p1648_p13 = scmp.ne.s32.totalorder %s2048_s11, %s1647_s12  ;;  %p1652_p4 = scmp.lt.u32.totalorder %s2048_s11, %s2100_s7 }
 0x93f   : > { %p1653_p5 = scmp.lt.u32.totalorder %s1651_s19, %s1647_s12  ;;  %p1655_p11 = scmp.lt.u32.totalorder %s1647_s12, %s2048_s11 }
 0x940   : > { %p1649_p6 = pnand %p1648_p13, %p2114_p0 }
 0x941   : > { %p1654_p8 = por %p1653_p5, %p1652_p4 }
 0x942   : > { %p1650_p10 = pneg %p1649_p6 }
 0x943   : > { %p1656_p1 = por %p1655_p11, %p1654_p8 }
 0x945   : > { %p1657_p3 = pnand %p1656_p1, %p1650_p10 }
 0x947   : > { %1660 = shalt.err (!%p1657_p3)
}
 0x948   : > { %1453 = dma.vmem_to_hbm [thread:$0]  (%p2114_p0), %s2050_s30, 128, %s2048_s11, %s1207_s28  }
 0x949 PF: > { %s1232_s9 = sand.u32 1, %s1691_s24   ;;  %p2115_p7 = scmp.ne.s32.totalorder %s2105_s8, 0 }
 0x94a   : > { %p2116_p9 = scmp.ge.s32.totalorder %s1703_s27, 2  ;;  %s1233_s20 = scalar_lea.sflag [#allocation4], %s1232_s9 }
 0x94c   : > { %p1467_p12 = pnand %p2116_p9, %p2115_p7 }
 0x94e   : > { %1686 = dma.done.wait (!%p1467_p12), %s1233_s20, 128  }
 0x94f   : > { %1688 = vsyncadd (!%p1467_p12), %s1233_s20, 4294967168  ;;  %p21_p2 = scmp.ge.s32.totalorder %s1878_s13, 4   ;;  %s2117_s24 = smov %s1695_s25 }
 0x950   : > { %s2118_s25 = smov %s1699_s26  ;;  %s2119_s26 = smov %s1894_s17 }
 0x951   : > { %s2120_s27 = smov %s1878_s13  ;;  %23 = sbr.rel (!%p21_p2) target bundleno = 6 (0x6), region = 101 }
 0x958   :  { %1238 = vsyncpa [#allocation3], 1 }
 0x959   :  { %1240 = vsyncpa [#allocation3 + $0x1], 1 }
 0x95a   :  { %1241 = vsyncpa [#allocation6], 1 }
 0x95b   :  { %1242 = vsyncpa [#allocation4], 1 }
 0x95c   :  { %1244 = vsyncpa [#allocation4 + $0x1], 1 }

</bundles_post_ra>
